<compile_context>
chip_gen: v5e
topology: v5e:2x2
jax: 0.10.0
libtpu: 0.0.40
codegen_flags: <defaults>
</compile_context>

<pallas_src>
import math

import jax
import jax.numpy as jnp
from jax import lax
from jax.experimental import pallas as pl
from jax.experimental.pallas import tpu as pltpu


def dqn_kernel(x_ref, w1_ref, b1_ref, w2_ref, b2_ref, o_ref):
    # Fused 2-layer MLP, fully resident in VMEM.
    # Weights are in PyTorch (out, in) layout; contract dim 1 with dim 1 so
    # no transpose is ever materialized (same math as x @ W.T + b).
    x = x_ref[...]                                              # (B, D_in)
    h = lax.dot_general(x, w1_ref[...],
                        (((1,), (1,)), ((), ())),
                        preferred_element_type=jnp.float32)     # (B, H)
    h = jnp.maximum(h + b1_ref[...], 0.0)                       # ReLU on VPU (f32)
    y = lax.dot_general(h, w2_ref[...],
                        (((1,), (1,)), ((), ())),
                        preferred_element_type=jnp.float32)     # (B, D_out_pad)
    o_ref[...] = (y + b2_ref[...]).astype(o_ref.dtype)


def prepare_params(w1, b1, w2, b2, *, lane=128):
    """One-time layout glue, hoisted out of the forward path.

    w1: (H, D_in), b1: (H,), w2: (D_out, H), b2: (D_out,)  -- PyTorch layout.
    Pads the output dimension of layer 2 to a multiple of 128 lanes so the
    kernel's stores are lane-dense (unmasked).
    """
    H = w1.shape[0]
    D_out = w2.shape[0]
    d_out_pad = ((D_out + lane - 1) // lane) * lane
    # TODO(synk): for large batches on v6e/v7x, additionally cast w1/w2 (and x)
    # to bfloat16 here; f32 accumulation in the kernel is preserved via
    # preferred_element_type.
    return {
        "w1": w1,                                                  # (H, D_in)
        "b1": b1.reshape(1, H),                                    # (1, H)
        "w2": jnp.pad(w2, ((0, d_out_pad - D_out), (0, 0))),       # (D_out_pad, H)
        "b2": jnp.pad(b2, (0, d_out_pad - D_out)).reshape(1, d_out_pad),
        "d_out": D_out,
    }


def dqn_forward(x, params, *, batch_tile=256):
    """x: (B, D_in) f32.  Returns (B, D_out)."""
    w1, b1 = params["w1"], params["b1"]
    w2, b2 = params["w2"], params["b2"]
    d_out = params["d_out"]
    B, D_in = x.shape
    d_out_pad = w2.shape[0]

    if B <= batch_tile:
        # Tiny problem: single invocation, whole operands resident in VMEM,
        # no grid / no pipelining machinery at all.
        y_pad = pl.pallas_call(
            dqn_kernel,
            out_shape=jax.ShapeDtypeStruct((B, d_out_pad), x.dtype),
            in_specs=[pl.BlockSpec(memory_space=pltpu.MemorySpace.VMEM)] * 5,
            out_specs=pl.BlockSpec(memory_space=pltpu.MemorySpace.VMEM),
        )(x, w1, b1, w2, b2)
    else:
        # Realistic DQN batch: stream the batch dim, keep weights resident
        # (constant index_map => no re-DMA), mark the axis parallel so v7x's
        # two TensorCores split the grid.
        tb = batch_tile
        y_pad = pl.pallas_call(
            dqn_kernel,
            out_shape=jax.ShapeDtypeStruct((B, d_out_pad), x.dtype),
            grid=(pl.cdiv(B, tb),),
            in_specs=[
                pl.BlockSpec((tb, D_in), lambda i: (i, 0)),
                pl.BlockSpec(w1.shape, lambda i: (0, 0)),
                pl.BlockSpec(b1.shape, lambda i: (0, 0)),
                pl.BlockSpec(w2.shape, lambda i: (0, 0)),
                pl.BlockSpec(b2.shape, lambda i: (0, 0)),
            ],
            out_specs=pl.BlockSpec((tb, d_out_pad), lambda i: (i, 0)),
            compiler_params=pltpu.CompilerParams(
                dimension_semantics=("parallel",)),
        )(x, w1, b1, w2, b2)

    # Slice the lane-padded output back to the logical D_out.
    return y_pad[:, :d_out]


def init_linear_params(key, fan_out, fan_in):
    """Deterministic PyTorch-style nn.Linear init: U(-1/sqrt(fan_in), 1/sqrt(fan_in))."""
    kw, kb = jax.random.split(key)
    bound = 1.0 / math.sqrt(fan_in)
    w = jax.random.uniform(kw, (fan_out, fan_in), jnp.float32, -bound, bound)
    b = jax.random.uniform(kb, (fan_out,), jnp.float32, -bound, bound)
    return w, b


if __name__ == "__main__":
    # Small shapes consistent with the module: DQN(D_in, H, D_out)
    B, D_in, H, D_out = 2, 32, 64, 6

    key = jax.random.PRNGKey(0)
    kx, k1, k2, kx2 = jax.random.split(key, 4)

    x = jax.random.normal(kx, (B, D_in), jnp.float32)
    w1, b1 = init_linear_params(k1, H, D_in)
    w2, b2 = init_linear_params(k2, D_out, H)

    params = prepare_params(w1, b1, w2, b2)

    # Small-batch (no-grid) path.
    y = dqn_forward(x, params)
    jax.block_until_ready(y)
    ref = jnp.maximum(x @ w1.T + b1, 0.0) @ w2.T + b2
    assert y.shape == (B, D_out)
    assert jnp.allclose(y, ref, atol=1e-5, rtol=1e-5)

    # Batch-tiled (training-sized) path.
    Bb = 512
    xb = jax.random.normal(kx2, (Bb, D_in), jnp.float32)
    yb = dqn_forward(xb, params, batch_tile=256)
    jax.block_until_ready(yb)
    refb = jnp.maximum(xb @ w1.T + b1, 0.0) @ w2.T + b2
    assert yb.shape == (Bb, D_out)
    assert jnp.allclose(yb, refb, atol=1e-4, rtol=1e-4)

    print("KERNEL_OK")
</pallas_src>

<mosaic_0001>
module attributes {stable_mosaic.version = 11 : i64} {
  func.func @dqn_kernel(%arg0: memref<2x32xf32, #tpu.memory_space<vmem>>, %arg1: memref<64x32xf32, #tpu.memory_space<vmem>>, %arg2: memref<1x64xf32, #tpu.memory_space<vmem>>, %arg3: memref<128x64xf32, #tpu.memory_space<vmem>>, %arg4: memref<1x128xf32, #tpu.memory_space<vmem>>, %arg5: memref<2x128xf32, #tpu.memory_space<vmem>>) attributes {dimension_semantics = [], scalar_prefetch = 0 : i64, scratch_operands = 0 : i64, tpu.core_type = #tpu.core_type<tc>} {
    %c0 = arith.constant 0 : index
    %c0_0 = arith.constant 0 : index
    %0 = vector.load %arg0[%c0, %c0_0] : memref<2x32xf32, #tpu.memory_space<vmem>>, vector<2x32xf32>
    %c0_1 = arith.constant 0 : index
    %c0_2 = arith.constant 0 : index
    %1 = vector.load %arg1[%c0_1, %c0_2] : memref<64x32xf32, #tpu.memory_space<vmem>>, vector<64x32xf32>
    %cst = arith.constant dense<0.000000e+00> : vector<2x64xf32>
    %2 = tpu.matmul %0, %1, %cst {dimension_numbers = #tpu.dot_dimension_numbers<[1], [1], [0], [0], [0, 0, 1, 0], [], []>} : vector<2x32xf32>, vector<64x32xf32>, vector<2x64xf32> -> vector<2x64xf32>
    %c0_3 = arith.constant 0 : index
    %c0_4 = arith.constant 0 : index
    %3 = vector.load %arg2[%c0_3, %c0_4] : memref<1x64xf32, #tpu.memory_space<vmem>>, vector<1x64xf32>
    %4 = vector.broadcast %3 : vector<1x64xf32> to vector<2x64xf32>
    %5 = arith.addf %2, %4 : vector<2x64xf32>
    %cst_5 = arith.constant 0.000000e+00 : f32
    %6 = vector.broadcast %cst_5 : f32 to vector<2x64xf32>
    %7 = arith.maximumf %5, %6 : vector<2x64xf32>
    %c0_6 = arith.constant 0 : index
    %c0_7 = arith.constant 0 : index
    %8 = vector.load %arg3[%c0_6, %c0_7] : memref<128x64xf32, #tpu.memory_space<vmem>>, vector<128x64xf32>
    %cst_8 = arith.constant dense<0.000000e+00> : vector<2x128xf32>
    %9 = tpu.matmul %7, %8, %cst_8 {dimension_numbers = #tpu.dot_dimension_numbers<[1], [1], [0], [0], [0, 0, 1, 0], [], []>} : vector<2x64xf32>, vector<128x64xf32>, vector<2x128xf32> -> vector<2x128xf32>
    %c0_9 = arith.constant 0 : index
    %c0_10 = arith.constant 0 : index
    %10 = vector.load %arg4[%c0_9, %c0_10] : memref<1x128xf32, #tpu.memory_space<vmem>>, vector<1x128xf32>
    %11 = vector.broadcast %10 : vector<1x128xf32> to vector<2x128xf32>
    %12 = arith.addf %9, %11 : vector<2x128xf32>
    %c0_11 = arith.constant 0 : index
    %c0_12 = arith.constant 0 : index
    %13 = vector.load %arg5[%c0_11, %c0_12] : memref<2x128xf32, #tpu.memory_space<vmem>>, vector<2x128xf32>
    tpu.vector_store %arg5[%c0_11, %c0_12], %12 {strides = array<i32>} : memref<2x128xf32, #tpu.memory_space<vmem>>, vector<2x128xf32>,
    return
  }
}

</mosaic_0001>

<bundles_post_ra>
// kernel: tpu_custom_call.1
= control target key start
LH: loop header
LB: loop body
LE: loop exit
PB: predicated region body
PF: predicated region fallthrough
CT: control target
= control target key end

     0   :  { %vm34_vm0 = vcmask 261120   ;;  %vm103_vm1 = vcmask 523264   ;;  %s388_s0 = inlined_call_operand.vmem [shape: f32[2,32], index: 0, kind: input, shape index: {}]   ;;  %s389_s1 = inlined_call_operand.vmem [shape: f32[64,32], index: 1, kind: input, shape index: {}]   ;;  %s390_s2 = inlined_call_operand.vmem [shape: f32[1,64], index: 2, kind: input, shape index: {}]   ;;  %s391_s3 = inlined_call_operand.vmem [shape: f32[128,64], index: 3, kind: input, shape index: {}]   ;;  %s392_s4 = inlined_call_operand.vmem [shape: f32[1,128], index: 4, kind: input, shape index: {}]   ;;  %s393_s5 = inlined_call_operand.hbm [shape: f32[2,128], index: 5, kind: output, shape index: {}]  }
   0x1   :  { %v29_v0 = vld [vmem:[%s389_s1 + $0x38] sm:$0xff]  ;;  %v28_v1 = vld [vmem:[%s389_s1 + $0x30] sm:$0xff]  ;;  %v27_v4 = vld [vmem:[%s389_s1 + $0x28] sm:$0xff] }
   0x2   :  { %192 = vmatpush.xpose.msk.msra.mxu0 %vm34_vm0, %v29_v0  ;;  %v98_v2 = vld [vmem:[%s391_s3 + $0x78] sm:$0xff]  ;;  %v97_v3 = vld [vmem:[%s391_s3 + $0x70] sm:$0xff] }
   0x3   :  { %201 = vmatpush.xpose.msk.msra.mxu1 %vm103_vm1, %v98_v2 }
   0x6   :  { %193 = vmatpush.xpose.msk.msra.mxu0 %vm34_vm0, %v28_v1 }
   0x7   :  { %10 = vsyncpa [#allocation3], 0  ;;  %202 = vmatpush.xpose.msk.msra.mxu1 %vm103_vm1, %v97_v3  ;;  %v96_v5 = vld [vmem:[%s391_s3 + $0x68] sm:$0xff]  ;;  %v26_v6 = vld [vmem:[%s389_s1 + $0x20] sm:$0xff]  ;;  %s247_s20 = smov [#allocation2]  }
   0x8   :  { %v95_v7 = vld [vmem:[%s391_s3 + $0x60] sm:$0xff]  ;;  %v25_v8 = vld [vmem:[%s389_s1 + $0x18] sm:$0xff]  ;;  %v24_v10 = vld [vmem:[%s389_s1 + $0x10] sm:$0xff]  ;;  %s181_s21 = sshll.u32 %s247_s20, 4  ;;  %s182_s21 = int_to_ptr.vmem [resolvable:$true] %s181_s21 }
   0x9   :  { %v94_v9 = vld [vmem:[%s391_s3 + $0x58] sm:$0xff]  ;;  %v93_v11 = vld [vmem:[%s391_s3 + $0x50] sm:$0xff]  ;;  %v23_v12 = vld [vmem:[%s389_s1 + $0x8] sm:$0xff] }
   0xa   :  { %194 = vmatpush.xpose.msk.msra.mxu0 %vm34_vm0, %v27_v4  ;;  %v92_v13 = vld [vmem:[%s391_s3 + $0x48] sm:$0xff]  ;;  %v22_v14 = vld [vmem:[%s389_s1] sm:$0xff]  ;;  %v90_v17 = vld [vmem:[%s391_s3 + $0x38] sm:$0xff] }
   0xb   :  { %203 = vmatpush.xpose.msk.msra.mxu1 %vm103_vm1, %v96_v5  ;;  %v21_v15 = vld [vmem:[%s388_s0] sm:$0x3]  ;;  %v89_v18 = vld [vmem:[%s391_s3 + $0x30] sm:$0xff]  ;;  %v88_v19 = vld [vmem:[%s391_s3 + $0x28] sm:$0xff] }
   0xc   :  { %v91_v16 = vld [vmem:[%s391_s3 + $0x40] sm:$0xff]  ;;  %v86_v21 = vld [vmem:[%s391_s3 + $0x18] sm:$0xff]  ;;  %v85_v22 = vld [vmem:[%s391_s3 + $0x10] sm:$0xff] }
   0xd   :  { %v87_v20 = vld [vmem:[%s391_s3 + $0x20] sm:$0xff]  ;;  %v84_v23 = vld [vmem:[%s391_s3 + $0x8] sm:$0xff] }
   0xe   :  { %195 = vmatpush.xpose.msk.msra.mxu0 %vm34_vm0, %v26_v6  ;;  %v83_v24 = vld [vmem:[%s391_s3] sm:$0xff]  ;;  %s183_s3 = sshll.u32 %s393_s5, 4  ;;  %s184_s3 = int_to_ptr.hbm [resolvable:$true] %s183_s3 }
   0xf   :  { %204 = vmatpush.xpose.msk.msra.mxu1 %vm103_vm1, %v95_v7  ;;  %v219_v25 = vld [vmem:[%s390_s2] ss:$0 sm:$0xff] }
  0x10   :  { %v220_v29 = vld [vmem:[%s392_s4] ss:$0 sm:$0xff] }
  0x12   :  { %196 = vmatpush.xpose.msk.msra.mxu0 %vm34_vm0, %v25_v8 }
  0x13   :  { %205 = vmatpush.xpose.msk.msra.mxu1 %vm103_vm1, %v94_v9 }
  0x16   :  { %197 = vmatpush.xpose.msk.msra.mxu0 %vm34_vm0, %v24_v10 }
  0x17   :  { %206 = vmatpush.xpose.msk.msra.mxu1 %vm103_vm1, %v93_v11 }
  0x1a   :  { %198 = vmatpush.xpose.msk.msra.mxu0 %vm34_vm0, %v23_v12 }
  0x1b   :  { %207 = vmatpush.xpose.msk.msra.mxu1 %vm103_vm1, %v92_v13 }
  0x1e   :  { %199 = vmatpush.xpose.msk.msra.mxu0 %vm34_vm0, %v22_v14 }
  0x1f   :  { %208 = vmatpush.xpose.msk.msra.mxu1 %vm103_vm1, %v91_v16 }
  0x21   :  { %200 = vmatmul.msk.f32.vlgmr.msra.gmra.mxu0 %vm34_vm0, %v21_v15 }
  0x23   :  { %209 = vmatpush.xpose.msk.msra.mxu1 %vm103_vm1, %v90_v17 }
  0x27   :  { %210 = vmatpush.xpose.msk.msra.mxu1 %vm103_vm1, %v89_v18 }
  0x2b   :  { %211 = vmatpush.xpose.msk.msra.mxu1 %vm103_vm1, %v88_v19 }
  0x2f   :  { %212 = vmatpush.xpose.msk.msra.mxu1 %vm103_vm1, %v87_v20 }
  0x33   :  { %213 = vmatpush.xpose.msk.msra.mxu1 %vm103_vm1, %v86_v21 }
  0x37   :  { %214 = vmatpush.xpose.msk.msra.mxu1 %vm103_vm1, %v85_v22 }
  0x3b   :  { %215 = vmatpush.xpose.msk.msra.mxu1 %vm103_vm1, %v84_v23 }
  0x3f   :  { %216 = vmatpush.xpose.msk.msra.mxu1 %vm103_vm1, %v83_v24 }
  0x9e   :  { %v79_v26 = vpop.f32.mrf.mxu0 }
  0x9f   :  { %v80_v27 = vadd.f32 %v219_v25, %v79_v26 }
  0xa1   :  { %v82_v28 = vmax.f32 %v80_v27, 0.0 }
  0xa3   :  { %217 = vmatmul.msk.f32.vlgmr.msra.gmra.mxu1 %vm103_vm1, %v82_v28 }
 0x120   :  { %v172_v30 = vpop.f32.mrf.mxu1 }
 0x121   :  { %v173_v31 = vadd.f32 %v220_v29, %v172_v30 }
 0x123   :  { %175 = vst [vmem:[#allocation2] sm:$0x3] %v173_v31 }
 0x124   :  { %186 = dma.vmem_to_hbm [thread:$0]  %s182_s21, 32, %s184_s3, [#allocation3]  }
 0x125   :  { %245 = dma.done.wait [#allocation3], 32  }
 0x126   :  { %246 = vsyncadd [#allocation3], 4294967264 }
 0x127   :  { %191 = vsyncpa [#allocation3], 1 }

</bundles_post_ra>
